<compile_context>
chip_gen: v6e
topology: v6e:2x2x1
jax: 0.10.0
libtpu: 0.0.40
codegen_flags: <defaults>
</compile_context>

<pallas_src>
import jax
import jax.numpy as jnp
from jax import lax
from jax.experimental import pallas as pl
from jax.experimental.pallas import tpu as pltpu


# --------------------------------------------------------------------------- #
# Kernels
# --------------------------------------------------------------------------- #
def _make_stats_kernel(L, lt):
    """Per-row (= per (n, c)) partial sum / sum-of-squares over the lane axis."""
    need_lane_mask = (L % lt) != 0

    def kernel(x_ref, sum_ref, ssq_ref):
        @pl.when(pl.program_id(1) == 0)
        def _():
            sum_ref[...] = jnp.zeros_like(sum_ref)
            ssq_ref[...] = jnp.zeros_like(ssq_ref)

        x = x_ref[...].astype(jnp.float32)                      # (rt, lt)
        if need_lane_mask:
            # Remainder lane tile: zero out-of-range lanes before accumulating.
            lane = lax.broadcasted_iota(jnp.int32, x.shape, 1)
            valid = (pl.program_id(1) * lt + lane) < L
            x = jnp.where(valid, x, 0.0)

        # Common regime has lt == L (single lane step per row block), so the
        # cross-lane (XLU) reduce + narrow (rt, 1) store happen once per row
        # block rather than in a long steady state.
        # TODO(synk): for ultra-large L (lane-tiled fallback) this keeps a
        # per-step XLU reduce; a VPU 128-lane partial would be better on v7x.
        sum_ref[...] += jnp.sum(x, axis=-1, keepdims=True)
        ssq_ref[...] += jnp.sum(x * x, axis=-1, keepdims=True)

    return kernel


def _normalize_kernel(x_ref, ss_ref, o_ref):
    # y = x * scale + shift; scale/shift are per-row, packed as ss[0]/ss[1].
    x = x_ref[...].astype(jnp.float32)                           # (rt, lt)
    scale = ss_ref[0]                                            # (rt, 1)
    shift = ss_ref[1]                                            # (rt, 1)
    o_ref[...] = (x * scale + shift).astype(o_ref.dtype)


def _make_fused_kernel(eps):
    """Whole-x-in-VMEM path: stats + normalize in one kernel (1 read, 1 write)."""
    def kernel(x_ref, w_ref, b_ref, o_ref):
        x = x_ref[...].astype(jnp.float32)                       # (N, C, L)
        n = x.shape[0] * x.shape[2]
        s = jnp.sum(jnp.sum(x, axis=2, keepdims=True), axis=0, keepdims=True)
        mean = s / n                                             # (1, C, 1)
        d = x - mean                                             # centered var
        var = jnp.sum(jnp.sum(d * d, axis=2, keepdims=True), axis=0,
                      keepdims=True) / n
        inv_std = lax.rsqrt(var + jnp.float32(eps))
        scale = w_ref[...] * inv_std                             # (1, C, 1)
        shift = b_ref[...] - mean * scale
        o_ref[...] = (x * scale + shift).astype(o_ref.dtype)
    return kernel


# --------------------------------------------------------------------------- #
# Tiling / VMEM planning
# --------------------------------------------------------------------------- #
def _vmem_limit_bytes():
    try:
        vmem_cap = int(pltpu.get_tpu_info().vmem_capacity_bytes)
    except Exception:
        vmem_cap = 64 << 20          # conservative (v7x per-TC) fallback
    return max(32 << 20, min(int(vmem_cap * 0.6), 96 << 20))


def _choose_tiles(NR, L, itemsize, blk_bytes):
    """Pick (row_tile, lane_tile) for a (NR, L) row view within blk_bytes."""
    sub_q = 16 if itemsize == 2 else (32 if itemsize == 1 else 8)
    row_bytes = max(L * itemsize, 1)
    if sub_q * row_bytes <= blk_bytes:
        lt = L                        # full rows -> no lane remainder at all
        want = blk_bytes // row_bytes
        if want >= NR:
            rt = NR                   # whole row axis in one block (full-dim)
        else:
            rt = max(sub_q, (want // sub_q) * sub_q)
    else:
        # Ultra-large L: tile lanes in multiples of 128 (masked remainder).
        rt = NR if NR < sub_q else sub_q
        lt = max(128, (blk_bytes // max(rt * itemsize, 1)) // 128 * 128)
        if lt >= L:
            lt = L
    return int(rt), int(lt)


# --------------------------------------------------------------------------- #
# Wrapper
# --------------------------------------------------------------------------- #
def perturbed_batchnorm2d(x, w_mean, w_var, b_mean, b_var, w_noise, b_noise,
                          eps=1e-5, *, force_tiled=False, tile_override=None):
    N, C, H, W = x.shape
    L = H * W
    NR = N * C
    itemsize = jnp.dtype(x.dtype).itemsize
    vmem_limit = _vmem_limit_bytes()

    # Perturbed affine params (O(C) plain JAX, computed once in the wrapper).
    w = (w_mean.astype(jnp.float32)
         + jax.nn.softplus(w_var.astype(jnp.float32)) * w_noise.astype(jnp.float32))
    b = (b_mean.astype(jnp.float32)
         + jax.nn.softplus(b_var.astype(jnp.float32)) * b_noise.astype(jnp.float32))

    # ---- Fused VMEM-resident fast path (1 read + 1 write of x) -------------
    x_f32_bytes = NR * L * 4
    if (not force_tiled) and (x_f32_bytes * 8 <= vmem_limit):
        xv = x.reshape(N, C, L)
        y = pl.pallas_call(
            _make_fused_kernel(eps),
            grid=(1,),
            in_specs=[pl.BlockSpec((N, C, L), lambda i: (0, 0, 0)),
                      pl.BlockSpec((1, C, 1), lambda i: (0, 0, 0)),
                      pl.BlockSpec((1, C, 1), lambda i: (0, 0, 0))],
            out_specs=pl.BlockSpec((N, C, L), lambda i: (0, 0, 0)),
            out_shape=jax.ShapeDtypeStruct((N, C, L), x.dtype),
            compiler_params=pltpu.CompilerParams(vmem_limit_bytes=vmem_limit),
            cost_estimate=pl.CostEstimate(flops=7 * NR * L, transcendentals=C,
                                          bytes_accessed=2 * NR * L * itemsize),
        )(xv, w.reshape(1, C, 1), b.reshape(1, C, 1))
        return y.reshape(N, C, H, W)

    # ---- Tiled two-pass path (2 reads + 1 write of x: HBM floor) -----------
    xv = x.reshape(NR, L)             # free reshape of contiguous NCHW

    if tile_override is not None:
        rt1 = rt2 = int(tile_override[0])
        lt1 = lt2 = int(tile_override[1])
    else:
        # Pass 1 keeps only 2 input buffers + tiny accumulators -> bigger block.
        rt1, lt1 = _choose_tiles(NR, L, itemsize, min(vmem_limit // 4, 6 << 20))
        # Pass 2 holds 2 input + 2 output buffers -> smaller block.
        rt2, lt2 = _choose_tiles(NR, L, itemsize, min(vmem_limit // 6, 4 << 20))

    # Pass 1: per-row partial sum / sumsq in f32.
    grid1 = (pl.cdiv(NR, rt1), pl.cdiv(L, lt1))
    psum, pssq = pl.pallas_call(
        _make_stats_kernel(L, lt1),
        grid=grid1,
        in_specs=[pl.BlockSpec((rt1, lt1), lambda r, l: (r, l))],
        out_specs=(pl.BlockSpec((rt1, 1), lambda r, l: (r, 0)),
                   pl.BlockSpec((rt1, 1), lambda r, l: (r, 0))),
        out_shape=(jax.ShapeDtypeStruct((NR, 1), jnp.float32),
                   jax.ShapeDtypeStruct((NR, 1), jnp.float32)),
        compiler_params=pltpu.CompilerParams(
            dimension_semantics=("parallel", "arbitrary"),
            vmem_limit_bytes=vmem_limit),
        cost_estimate=pl.CostEstimate(flops=3 * NR * L, transcendentals=0,
                                      bytes_accessed=NR * L * itemsize + 8 * NR),
    )(xv)

    # Tiny O(N*C) combine + per-row scale/shift (plain JAX).
    count = jnp.float32(N * L)
    s = psum[:, 0].reshape(N, C).sum(axis=0)
    ss = pssq[:, 0].reshape(N, C).sum(axis=0)
    mean = s / count
    # TODO(synk): E[x^2]-mean^2 in f32 loses precision when |mean| >> std;
    # the clamp only prevents negative variance, not the cancellation itself.
    var = jnp.maximum(ss / count - mean * mean, 0.0)
    inv_std = lax.rsqrt(var + jnp.float32(eps))
    scale_c = w * inv_std
    shift_c = b - mean * scale_c
    ss_rows = jnp.stack(
        [jnp.broadcast_to(scale_c[None, :], (N, C)).reshape(NR),
         jnp.broadcast_to(shift_c[None, :], (N, C)).reshape(NR)],
        axis=0)[:, :, None]                                     # (2, NR, 1) f32

    # Pass 2: y = x * scale + shift (fully parallel, lane-dense tiles).
    grid2 = (pl.cdiv(NR, rt2), pl.cdiv(L, lt2))
    y = pl.pallas_call(
        _normalize_kernel,
        grid=grid2,
        in_specs=[pl.BlockSpec((rt2, lt2), lambda r, l: (r, l)),
                  pl.BlockSpec((2, rt2, 1), lambda r, l: (0, r, 0))],
        out_specs=pl.BlockSpec((rt2, lt2), lambda r, l: (r, l)),
        out_shape=jax.ShapeDtypeStruct((NR, L), x.dtype),
        compiler_params=pltpu.CompilerParams(
            dimension_semantics=("parallel", "parallel"),
            vmem_limit_bytes=vmem_limit),
        cost_estimate=pl.CostEstimate(flops=2 * NR * L, transcendentals=0,
                                      bytes_accessed=2 * NR * L * itemsize + 8 * NR),
    )(xv, ss_rows)

    return y.reshape(N, C, H, W)


# --------------------------------------------------------------------------- #
# Reference + self-test
# --------------------------------------------------------------------------- #
def _reference(x, w_mean, w_var, b_mean, b_var, w_noise, b_noise, eps):
    w = w_mean + jax.nn.softplus(w_var) * w_noise
    b = b_mean + jax.nn.softplus(b_var) * b_noise
    mu = jnp.mean(x, axis=(0, 2, 3), keepdims=True)
    va = jnp.mean((x - mu) ** 2, axis=(0, 2, 3), keepdims=True)
    return ((x - mu) / jnp.sqrt(va + eps) * w[None, :, None, None]
            + b[None, :, None, None])


def _make_params(key, C, init_var=-4.0):
    kw, kb = jax.random.split(key)
    w_mean = jnp.ones((C,), jnp.float32)           # nn.BatchNorm2d weight init
    b_mean = jnp.zeros((C,), jnp.float32)          # nn.BatchNorm2d bias init
    w_var = jnp.full((C,), init_var, jnp.float32)  # PerturbedLayer init_var
    b_var = jnp.full((C,), init_var, jnp.float32)
    w_noise = jax.random.normal(kw, (C,), dtype=jnp.float32)   # perturb draws
    b_noise = jax.random.normal(kb, (C,), dtype=jnp.float32)
    return w_mean, w_var, b_mean, b_var, w_noise, b_noise


if __name__ == "__main__":
    key = jax.random.PRNGKey(0)
    kx1, kp1, kx2, kp2 = jax.random.split(key, 4)
    eps = 1e-5

    # 1) Small shape -> fused VMEM-resident path.
    N, C, H, W = 2, 4, 16, 16
    x1 = jax.random.normal(kx1, (N, C, H, W), dtype=jnp.float32)
    p1 = _make_params(kp1, C)
    y_fused = jax.block_until_ready(perturbed_batchnorm2d(x1, *p1, eps=eps))
    ref1 = _reference(x1, *p1, eps)
    assert jnp.max(jnp.abs(y_fused - ref1)) < 2e-4, "fused path mismatch"

    # 2) Same input through the tiled two-pass path (auto tiles).
    y_tiled = jax.block_until_ready(
        perturbed_batchnorm2d(x1, *p1, eps=eps, force_tiled=True))
    assert jnp.max(jnp.abs(y_tiled - ref1)) < 2e-4, "tiled path mismatch"

    # 3) Ragged shape + forced small tiles: exercises cdiv grids with masked
    #    lane remainder and clamped row remainder.
    N2, C2, H2, W2 = 3, 5, 10, 13
    x2 = jax.random.normal(kx2, (N2, C2, H2, W2), dtype=jnp.float32)
    p2 = _make_params(kp2, C2)
    y_rag = jax.block_until_ready(
        perturbed_batchnorm2d(x2, *p2, eps=eps, force_tiled=True,
                              tile_override=(8, 128)))
    ref2 = _reference(x2, *p2, eps)
    assert jnp.max(jnp.abs(y_rag - ref2)) < 2e-4, "ragged tiled path mismatch"

    print("KERNEL_OK")
</pallas_src>

<mosaic_0001>
module attributes {stable_mosaic.version = 11 : i64} {
  func.func @kernel(%arg0: i32, %arg1: memref<2x4x256xf32, #tpu.memory_space<vmem>>, %arg2: memref<1x4x1xf32, #tpu.memory_space<vmem>>, %arg3: memref<1x4x1xf32, #tpu.memory_space<vmem>>, %arg4: memref<2x4x256xf32, #tpu.memory_space<vmem>>) attributes {dimension_semantics = [#tpu.dimension_semantics<arbitrary>], iteration_bounds = array<i64: 1>, scalar_prefetch = 0 : i64, scratch_operands = 0 : i64, tpu.core_type = #tpu.core_type<tc>, window_params = [{pipeline_mode = #tpu.pipeline_mode<synchronous>, transform_indices = @transform_0, window_bounds = array<i64: 2, 4, 256>}, {pipeline_mode = #tpu.pipeline_mode<synchronous>, transform_indices = @transform_1, window_bounds = array<i64: 1, 4, 1>}, {pipeline_mode = #tpu.pipeline_mode<synchronous>, transform_indices = @transform_2, window_bounds = array<i64: 1, 4, 1>}, {pipeline_mode = #tpu.pipeline_mode<synchronous>, transform_indices = @transform_3, window_bounds = array<i64: 2, 4, 256>}]} {
    %c0 = arith.constant 0 : index
    %c0_0 = arith.constant 0 : index
    %c0_1 = arith.constant 0 : index
    %0 = vector.load %arg1[%c0, %c0_0, %c0_1] : memref<2x4x256xf32, #tpu.memory_space<vmem>>, vector<2x4x256xf32>
    %cst = arith.constant dense<0.000000e+00> : vector<2x4xf32>
    %1 = vector.multi_reduction <add>, %0, %cst [2] : vector<2x4x256xf32> to vector<2x4xf32>
    %2 = vector.shape_cast %1 : vector<2x4xf32> to vector<2x4x1xf32>
    %cst_2 = arith.constant dense<0.000000e+00> : vector<4x1xf32>
    %3 = vector.multi_reduction <add>, %2, %cst_2 [0] : vector<2x4x1xf32> to vector<4x1xf32>
    %4 = vector.shape_cast %3 : vector<4x1xf32> to vector<1x4x1xf32>
    %cst_3 = arith.constant 5.120000e+02 : f32
    %5 = vector.broadcast %cst_3 : f32 to vector<1x4x1xf32>
    %6 = arith.divf %4, %5 : vector<1x4x1xf32>
    %7 = vector.broadcast %6 : vector<1x4x1xf32> to vector<2x4x256xf32>
    %8 = arith.subf %0, %7 : vector<2x4x256xf32>
    %9 = arith.mulf %8, %8 : vector<2x4x256xf32>
    %cst_4 = arith.constant dense<0.000000e+00> : vector<2x4xf32>
    %10 = vector.multi_reduction <add>, %9, %cst_4 [2] : vector<2x4x256xf32> to vector<2x4xf32>
    %11 = vector.shape_cast %10 : vector<2x4xf32> to vector<2x4x1xf32>
    %cst_5 = arith.constant dense<0.000000e+00> : vector<4x1xf32>
    %12 = vector.multi_reduction <add>, %11, %cst_5 [0] : vector<2x4x1xf32> to vector<4x1xf32>
    %13 = vector.shape_cast %12 : vector<4x1xf32> to vector<1x4x1xf32>
    %cst_6 = arith.constant 5.120000e+02 : f32
    %14 = vector.broadcast %cst_6 : f32 to vector<1x4x1xf32>
    %15 = arith.divf %13, %14 : vector<1x4x1xf32>
    %cst_7 = arith.constant 9.99999974E-6 : f32
    %16 = vector.broadcast %cst_7 : f32 to vector<1x4x1xf32>
    %17 = arith.addf %15, %16 : vector<1x4x1xf32>
    %18 = math.rsqrt %17 : vector<1x4x1xf32>
    %c0_8 = arith.constant 0 : index
    %c0_9 = arith.constant 0 : index
    %c0_10 = arith.constant 0 : index
    %19 = vector.load %arg2[%c0_8, %c0_9, %c0_10] : memref<1x4x1xf32, #tpu.memory_space<vmem>>, vector<1x4x1xf32>
    %20 = arith.mulf %19, %18 : vector<1x4x1xf32>
    %c0_11 = arith.constant 0 : index
    %c0_12 = arith.constant 0 : index
    %c0_13 = arith.constant 0 : index
    %21 = vector.load %arg3[%c0_11, %c0_12, %c0_13] : memref<1x4x1xf32, #tpu.memory_space<vmem>>, vector<1x4x1xf32>
    %22 = arith.mulf %6, %20 : vector<1x4x1xf32>
    %23 = arith.subf %21, %22 : vector<1x4x1xf32>
    %24 = vector.broadcast %20 : vector<1x4x1xf32> to vector<2x4x256xf32>
    %25 = arith.mulf %0, %24 : vector<2x4x256xf32>
    %26 = vector.broadcast %23 : vector<1x4x1xf32> to vector<2x4x256xf32>
    %27 = arith.addf %25, %26 : vector<2x4x256xf32>
    %c0_14 = arith.constant 0 : index
    %c0_15 = arith.constant 0 : index
    %c0_16 = arith.constant 0 : index
    %28 = vector.load %arg4[%c0_14, %c0_15, %c0_16] : memref<2x4x256xf32, #tpu.memory_space<vmem>>, vector<2x4x256xf32>
    tpu.vector_store %arg4[%c0_14, %c0_15, %c0_16], %27 {strides = array<i32>} : memref<2x4x256xf32, #tpu.memory_space<vmem>>, vector<2x4x256xf32>,
    return
  }
  func.func @transform_0(%arg0: i32) -> (i32, i32, i32) {
    %c0_i32 = arith.constant 0 : i32
    %c0_i32_0 = arith.constant 0 : i32
    %c0_i32_1 = arith.constant 0 : i32
    %c0_i32_2 = arith.constant 0 : i32
    return %c0_i32, %c0_i32_0, %c0_i32_1 : i32, i32, i32
  }
  func.func @transform_1(%arg0: i32) -> (i32, i32, i32) {
    %c0_i32 = arith.constant 0 : i32
    %c0_i32_0 = arith.constant 0 : i32
    %c0_i32_1 = arith.constant 0 : i32
    %c0_i32_2 = arith.constant 0 : i32
    return %c0_i32, %c0_i32_0, %c0_i32_1 : i32, i32, i32
  }
  func.func @transform_2(%arg0: i32) -> (i32, i32, i32) {
    %c0_i32 = arith.constant 0 : i32
    %c0_i32_0 = arith.constant 0 : i32
    %c0_i32_1 = arith.constant 0 : i32
    %c0_i32_2 = arith.constant 0 : i32
    return %c0_i32, %c0_i32_0, %c0_i32_1 : i32, i32, i32
  }
  func.func @transform_3(%arg0: i32) -> (i32, i32, i32) {
    %c0_i32 = arith.constant 0 : i32
    %c0_i32_0 = arith.constant 0 : i32
    %c0_i32_1 = arith.constant 0 : i32
    %c0_i32_2 = arith.constant 0 : i32
    return %c0_i32, %c0_i32_0, %c0_i32_1 : i32, i32, i32
  }
}

</mosaic_0001>

<bundles_post_ra>
// kernel: tpu_custom_call.1
= control target key start
LH: loop header
LB: loop body
LE: loop exit
PB: predicated region body
PF: predicated region fallthrough
CT: control target
= control target key end

     0   :  { %8 = vsyncpa [#allocation3], 0  ;;  %s266_s0 = inlined_call_operand.hbm [shape: f32[2,4,256], index: 0, kind: input, shape index: {}]   ;;  %s267_s1 = inlined_call_operand.vmem [shape: f32[1,4,1], index: 1, kind: input, shape index: {}]   ;;  %s268_s2 = inlined_call_operand.vmem [shape: f32[1,4,1], index: 2, kind: input, shape index: {}]   ;;  %s269_s3 = inlined_call_operand.hbm [shape: f32[2,4,256], index: 3, kind: output, shape index: {}]  }
   0x1   :  { %9 = vsyncpa [#allocation4], 0  ;;  %s196_s12 = smov [#allocation2]  }
   0x2   :  { %s15_s13 = sshll.u32 %s196_s12, 4  ;;  %s16_s13 = int_to_ptr.vmem [resolvable:$true] %s15_s13 }
   0x3   :  { %s160_s14 = scalar_lea.vmem %s16_s13, 256  ;;  %p165_p1 = scmp.lt.s32.totalorder %s16_s13, %s16_s13 }
   0x4   :  { %p161_p0 = scmp.ne.s32.totalorder %s16_s13, %s160_s14  ;;  %p166_p2 = scmp.lt.s32.totalorder %s160_s14, %s160_s14 }
   0x6   :  { %p167_p3 = por %p166_p2, %p165_p1 }
   0x8   :  { %p168_p4 = pnand %p167_p3, %p161_p0 }
   0xa   :  { %171 = shalt.err (!%p168_p4)
}
   0xb   :  { %s197_s15 = smov 128   ;;  %s198_s16 = smov 8  }
   0xc   :  { %21 = dma.hbm_to_vmem [thread:$0]  %s266_s0, 256, %s16_s13, [#allocation3], %s197_s15, %s197_s15, %s198_s16  }
   0xd   :  { %192 = dma.done.wait [#allocation3], 256  }
   0xe   :  { %193 = vsyncadd [#allocation3], 4294967040  ;;  %vm37_vm0 = vcmask 1043456   ;;  %v228_v0 = vld [vmem:[#allocation2] sm:$0xff]  ;;  %v230_v1 = vld [vmem:[#allocation2 + $0x8] sm:$0xff]  ;;  %v57_v12 = vlaneseq  ;;  %v200_v35 = vmov 0  }
   0xf   :  { %v33_v2 = vcombine.high %v228_v0, %v228_v0  ;;  %v38_v3 = vsel %vm37_vm0, %v228_v0, 0.0  ;;  %v34_v4 = vcombine.high %v230_v1, %v230_v1  ;;  %v43_v6 = vsel %vm37_vm0, %v230_v1, 0.0  ;;  %146 = vset.pattern.permute.xlu0 %v200_v35  ;;  %147 = vset.pattern.permute.xlu1 %v200_v35  ;;  %v88_v43 = vld [vmem:[%s267_s1] sm:$0xf]  ;;  %s201_s22 = smov [#allocation5]  }
  0x10   :  { %v199_v10 = vmov 839922192   ;;  %v58_v15 = vshrl.u32 %v57_v12, 7  ;;  %v90_v46 = vld [vmem:[%s268_s2] sm:$0xf]  ;;  %s128_s23 = sshll.u32 %s201_s22, 4  ;;  %s129_s23 = int_to_ptr.vmem [resolvable:$true] %s128_s23 }
  0x11   :  { %v39_v5 = vsel %vm37_vm0, %v33_v2, 0.0  ;;  %v44_v7 = vsel %vm37_vm0, %v34_v4, 0.0  ;;  %v55_v11 = vunpack.c.l.s4 %v199_v10  ;;  %s172_s1 = scalar_lea.vmem %s129_s23, 256  ;;  %p177_p6 = scmp.lt.s32.totalorder %s129_s23, %s129_s23 }
  0x12   :  { %v40_v8 = vadd.f32 %v39_v5, %v38_v3  ;;  %v45_v9 = vadd.f32 %v44_v7, %v43_v6  ;;  %p173_p5 = scmp.ne.s32.totalorder %s129_s23, %s172_s1  ;;  %p178_p7 = scmp.lt.s32.totalorder %s172_s1, %s172_s1 }
  0x13   :  { %v56_v14 = vunpack.c.0.s8 %v55_v11 }
  0x14   :  { %41 = vadd.xlane.f32.xlu0 %v40_v8  ;;  %p179_p8 = por %p178_p7, %p177_p6 }
  0x15   :  { %v59_v19 = vsub.s32 %v56_v14, %v58_v15 }
  0x16   :  { %p180_p9 = pnand %p179_p8, %p173_p5 }
  0x18   :  { %46 = vadd.xlane.f32.xlu0 %v45_v9 }
  0x9d   :  { %v42_v13 = vpop.xlane.xlu0 %41 }
  0x9e   :  { %v48_v17 = vsel %vm37_vm0, %v42_v13, 0.0 }
  0xa1   :  { %v47_v16 = vpop.xlane.xlu0 %46 }
  0xa2   :  { %v49_v18 = vsel %vm37_vm0, %v47_v16, 0.0 }
  0xa3   :  { %v50_v20 = vadd.f32 %v49_v18, %v48_v17 }
  0xa5   :  { %v52_v21 = vmul.f32 0.001953125, %v50_v20 }
  0xa7   :  { %v60_v22 = vrot.slane %v52_v21, %v59_v19 }
  0xa9   :  { %v62_v23 = vsub.f32 %v228_v0, %v60_v22  ;;  %v63_v24 = vsub.f32 %v230_v1, %v60_v22 }
  0xab   :  { %v64_v25 = vmul.f32 %v62_v23, %v62_v23  ;;  %v65_v26 = vmul.f32 %v63_v24, %v63_v24 }
  0xad   :  { %v68_v27 = vcombine.high %v64_v25, %v64_v25  ;;  %v69_v28 = vcombine.high %v65_v26, %v65_v26  ;;  %v72_v29 = vsel %vm37_vm0, %v64_v25, 0.0  ;;  %v77_v33 = vsel %vm37_vm0, %v65_v26, 0.0 }
  0xaf   :  { %v73_v30 = vsel %vm37_vm0, %v68_v27, 0.0  ;;  %v78_v32 = vsel %vm37_vm0, %v69_v28, 0.0 }
  0xb0   :  { %v74_v31 = vadd.f32 %v73_v30, %v72_v29  ;;  %v79_v34 = vadd.f32 %v78_v32, %v77_v33 }
  0xb2   :  { %75 = vadd.xlane.f32.xlu1 %v74_v31 }
  0xb6   :  { %80 = vadd.xlane.f32.xlu1 %v79_v34 }
 0x13b   :  { %v76_v36 = vpop.xlane.xlu1 %75 }
 0x13c   :  { %v82_v38 = vsel %vm37_vm0, %v76_v36, 0.0 }
 0x13f   :  { %v81_v37 = vpop.xlane.xlu1 %80 }
 0x140   :  { %v83_v39 = vsel %vm37_vm0, %v81_v37, 0.0 }
 0x141   :  { %v84_v40 = vadd.f32 %v83_v39, %v82_v38 }
 0x143   :  { %v85_v41 = vmul.f32 0.001953125, %v84_v40 }
 0x145   :  { %v86_v42 = vadd.f32 1e-05, %v85_v41 }
 0x147   :  { %150 = vrsqrt.f32 %v86_v42 }
 0x154   :  { %v151_v44 = vpop.eup %150 }
 0x155   :  { %v89_v45 = vmul.f32 %v151_v44, %v88_v43 }
 0x157   :  { %95 = vperm.xlu0 %146, %v89_v45   ;;  %v91_v47 = vmul.f32 %v89_v45, %v52_v21 }
 0x159   :  { %v92_v48 = vsub.f32 %v90_v46, %v91_v47 }
 0x15b   :  { %109 = vperm.xlu1 %147, %v92_v48  }
 0x1d2   :  { %v96_v49 = vpop.permute.xlu0 %95 }
 0x1d3   :  { %v103_v50 = vrot.slane %v96_v49, %v59_v19 }
 0x1d5   :  { %v105_v52 = vmul.f32 %v103_v50, %v228_v0  ;;  %v106_v53 = vmul.f32 %v103_v50, %v230_v1 }
 0x1d6   :  { %v110_v51 = vpop.permute.xlu1 %109 }
 0x1d7   :  { %v117_v54 = vrot.slane %v110_v51, %v59_v19 }
 0x1d9   :  { %v119_v55 = vadd.f32 %v117_v54, %v105_v52  ;;  %v120_v56 = vadd.f32 %v117_v54, %v106_v53 }
 0x1db   :  { %121 = vst [vmem:[#allocation5] sm:$0xff] %v119_v55  ;;  %122 = vst [vmem:[#allocation5 + $0x8] sm:$0xff] %v120_v56 }
 0x1dc   :  { %183 = shalt.err (!%p180_p9)
}
 0x1dd   :  { %134 = dma.vmem_to_hbm [thread:$0]  %s129_s23, 256, %s269_s3, [#allocation4], %s197_s15, %s197_s15, %s198_s16  }
 0x1de   :  { %194 = dma.done.wait [#allocation4], 256  }
 0x1df   :  { %195 = vsyncadd [#allocation4], 4294967040 }
 0x1e0   :  { %138 = vsyncpa [#allocation3], 1 }
 0x1e1   :  { %139 = vsyncpa [#allocation4], 1 }

</bundles_post_ra>
